<compile_context>
chip_gen: v5e
topology: v5e:2x2
jax: 0.10.0
libtpu: 0.0.40
codegen_flags: <defaults>
</compile_context>

<pallas_src>
import functools

import jax
import jax.numpy as jnp
import numpy as np
from jax.experimental import pallas as pl
from jax.experimental.pallas import tpu as pltpu


def _round_up(n, m):
    return ((n + m - 1) // m) * m


# ----------------------------------------------------------------------------
# Pallas kernel: one grid step normalizes a (bm, H) row block.
# ----------------------------------------------------------------------------
def _layer_norm_kernel(x_ref, a_ref, b_ref, o_ref, *, eps, hidden):
    x = x_ref[...].astype(jnp.float32)                       # (bm, H)
    mean = jnp.mean(x, axis=-1, keepdims=True)               # XLU reduce
    xc = x - mean
    # torch.var default is unbiased -> divide by (H - 1).
    var = jnp.sum(xc * xc, axis=-1, keepdims=True) * (1.0 / (hidden - 1))
    inv_std = jax.lax.rsqrt(var + eps)                       # EUP
    y = xc * inv_std
    o_ref[...] = (a_ref[...] * y + b_ref[...]).astype(o_ref.dtype)


# ----------------------------------------------------------------------------
# Wrapper: flatten leading dims, tile rows, pallas_call, unflatten.
# ----------------------------------------------------------------------------
def layer_norm(x, a, b, *, eps=1e-6, block_rows=256):
    hidden = x.shape[-1]
    if hidden == 1:
        # Same passthrough as the PyTorch module.
        return x

    orig_shape = x.shape
    orig_dtype = x.dtype

    x2 = x.reshape(-1, hidden)
    n = x2.shape[0]

    # Row block: multiple of 8 (sublanes), capped at block_rows; pad rows.
    bm = min(block_rows, _round_up(n, 8))
    n_pad = _round_up(n, bm)
    if n_pad != n:
        x2 = jnp.pad(x2, ((0, n_pad - n), (0, 0)))

    a2 = a.reshape(1, hidden).astype(jnp.float32)
    b2 = b.reshape(1, hidden).astype(jnp.float32)

    kernel = functools.partial(_layer_norm_kernel, eps=float(eps), hidden=hidden)

    out = pl.pallas_call(
        kernel,
        out_shape=jax.ShapeDtypeStruct((n_pad, hidden), orig_dtype),
        grid_spec=pltpu.PrefetchScalarGridSpec(
            num_scalar_prefetch=0,
            grid=(n_pad // bm,),
            in_specs=[
                pl.BlockSpec((bm, hidden), lambda i: (i, 0)),    # x row block
                pl.BlockSpec((1, hidden), lambda i: (0, 0)),     # a (gain)
                pl.BlockSpec((1, hidden), lambda i: (0, 0)),     # b (bias)
            ],
            out_specs=pl.BlockSpec((bm, hidden), lambda i: (i, 0)),
        ),
        compiler_params=pltpu.CompilerParams(
            dimension_semantics=("parallel",)),                  # rows independent
    )(x2, a2, b2)

    return out[:n].reshape(orig_shape)


# ----------------------------------------------------------------------------
# Pure-JAX reference mirroring the PyTorch module (unbiased var).
# ----------------------------------------------------------------------------
def layer_norm_reference(x, a, b, eps=1e-6):
    if x.shape[-1] == 1:
        return x
    mean = jnp.mean(x, axis=-1, keepdims=True)
    var = jnp.var(x, axis=-1, keepdims=True, ddof=1)   # torch.var: unbiased
    std = jnp.sqrt(var + eps)
    return a * (x - mean) / std + b


if __name__ == "__main__":
    key = jax.random.PRNGKey(0)
    kx1, kx2, ka, kb = jax.random.split(key, 4)

    # --- Test 1: small, ragged row count (forces row padding), H = 128 ------
    seq, batch, hidden = 5, 3, 128
    x1 = jax.random.normal(kx1, (seq, batch, hidden), dtype=jnp.float32)
    a1 = 1.0 + 0.1 * jax.random.normal(ka, (hidden,), dtype=jnp.float32)
    b1 = 0.1 * jax.random.normal(kb, (hidden,), dtype=jnp.float32)

    y1 = layer_norm(x1, a1, b1, eps=1e-6)
    jax.block_until_ready(y1)
    y1_ref = layer_norm_reference(x1, a1, b1, eps=1e-6)
    np.testing.assert_allclose(np.asarray(y1), np.asarray(y1_ref),
                               rtol=1e-4, atol=1e-4)

    # --- Test 2: multi-block grid (512 rows -> 2 grid steps of 256), H = 256 -
    seq2, batch2, hidden2 = 64, 8, 256
    x2 = jax.random.normal(kx2, (seq2, batch2, hidden2), dtype=jnp.float32)
    a2 = jnp.ones((hidden2,), jnp.float32)          # module's default init
    b2 = jnp.zeros((hidden2,), jnp.float32)

    y2 = layer_norm(x2, a2, b2, eps=1e-6)
    jax.block_until_ready(y2)
    y2_ref = layer_norm_reference(x2, a2, b2, eps=1e-6)
    np.testing.assert_allclose(np.asarray(y2), np.asarray(y2_ref),
                               rtol=1e-4, atol=1e-4)

    # --- Test 3: hidden == 1 passthrough (matches the PyTorch early return) --
    x3 = jax.random.normal(kx1, (4, 7, 1), dtype=jnp.float32)
    y3 = layer_norm(x3, jnp.ones((1,)), jnp.zeros((1,)))
    np.testing.assert_allclose(np.asarray(y3), np.asarray(x3))

    print("KERNEL_OK")
</pallas_src>

<mosaic_0001>
module attributes {stable_mosaic.version = 11 : i64} {
  func.func @_layer_norm_kernel(%arg0: i32, %arg1: memref<16x128xf32, #tpu.memory_space<vmem>>, %arg2: memref<1x128xf32, #tpu.memory_space<vmem>>, %arg3: memref<1x128xf32, #tpu.memory_space<vmem>>, %arg4: memref<16x128xf32, #tpu.memory_space<vmem>>) attributes {dimension_semantics = [#tpu.dimension_semantics<parallel>], iteration_bounds = array<i64: 1>, scalar_prefetch = 0 : i64, scratch_operands = 0 : i64, tpu.core_type = #tpu.core_type<tc>, window_params = [{transform_indices = @transform_0, window_bounds = array<i64: 16, 128>}, {pipeline_mode = #tpu.pipeline_mode<synchronous>, transform_indices = @transform_1, window_bounds = array<i64: 1, 128>}, {pipeline_mode = #tpu.pipeline_mode<synchronous>, transform_indices = @transform_2, window_bounds = array<i64: 1, 128>}, {transform_indices = @transform_3, window_bounds = array<i64: 16, 128>}]} {
    %c0 = arith.constant 0 : index
    %c0_0 = arith.constant 0 : index
    %0 = vector.load %arg1[%c0, %c0_0] : memref<16x128xf32, #tpu.memory_space<vmem>>, vector<16x128xf32>
    %cst = arith.constant dense<0.000000e+00> : vector<16xf32>
    %1 = vector.multi_reduction <add>, %0, %cst [1] : vector<16x128xf32> to vector<16xf32>
    %2 = vector.shape_cast %1 : vector<16xf32> to vector<16x1xf32>
    %cst_1 = arith.constant 1.280000e+02 : f32
    %3 = vector.broadcast %cst_1 : f32 to vector<16x1xf32>
    %4 = arith.divf %2, %3 : vector<16x1xf32>
    %5 = vector.broadcast %4 : vector<16x1xf32> to vector<16x128xf32>
    %6 = arith.subf %0, %5 : vector<16x128xf32>
    %7 = arith.mulf %6, %6 : vector<16x128xf32>
    %cst_2 = arith.constant dense<0.000000e+00> : vector<16xf32>
    %8 = vector.multi_reduction <add>, %7, %cst_2 [1] : vector<16x128xf32> to vector<16xf32>
    %9 = vector.shape_cast %8 : vector<16xf32> to vector<16x1xf32>
    %cst_3 = arith.constant 0.00787401571 : f32
    %10 = vector.broadcast %cst_3 : f32 to vector<16x1xf32>
    %11 = arith.mulf %9, %10 : vector<16x1xf32>
    %cst_4 = arith.constant 9.99999997E-7 : f32
    %12 = vector.broadcast %cst_4 : f32 to vector<16x1xf32>
    %13 = arith.addf %11, %12 : vector<16x1xf32>
    %14 = math.rsqrt %13 : vector<16x1xf32>
    %15 = vector.broadcast %14 : vector<16x1xf32> to vector<16x128xf32>
    %16 = arith.mulf %6, %15 : vector<16x128xf32>
    %c0_5 = arith.constant 0 : index
    %c0_6 = arith.constant 0 : index
    %17 = vector.load %arg2[%c0_5, %c0_6] : memref<1x128xf32, #tpu.memory_space<vmem>>, vector<1x128xf32>
    %18 = vector.broadcast %17 : vector<1x128xf32> to vector<16x128xf32>
    %19 = arith.mulf %18, %16 : vector<16x128xf32>
    %c0_7 = arith.constant 0 : index
    %c0_8 = arith.constant 0 : index
    %20 = vector.load %arg3[%c0_7, %c0_8] : memref<1x128xf32, #tpu.memory_space<vmem>>, vector<1x128xf32>
    %21 = vector.broadcast %20 : vector<1x128xf32> to vector<16x128xf32>
    %22 = arith.addf %19, %21 : vector<16x128xf32>
    %c0_9 = arith.constant 0 : index
    %c0_10 = arith.constant 0 : index
    %23 = vector.load %arg4[%c0_9, %c0_10] : memref<16x128xf32, #tpu.memory_space<vmem>>, vector<16x128xf32>
    tpu.vector_store %arg4[%c0_9, %c0_10], %22 {strides = array<i32>} : memref<16x128xf32, #tpu.memory_space<vmem>>, vector<16x128xf32>,
    return
  }
  func.func @transform_0(%arg0: i32) -> (i32, i32) {
    %c0_i32 = arith.constant 0 : i32
    %c0_i32_0 = arith.constant 0 : i32
    return %arg0, %c0_i32 : i32, i32
  }
  func.func @transform_1(%arg0: i32) -> (i32, i32) {
    %c0_i32 = arith.constant 0 : i32
    %c0_i32_0 = arith.constant 0 : i32
    %c0_i32_1 = arith.constant 0 : i32
    return %c0_i32, %c0_i32_0 : i32, i32
  }
  func.func @transform_2(%arg0: i32) -> (i32, i32) {
    %c0_i32 = arith.constant 0 : i32
    %c0_i32_0 = arith.constant 0 : i32
    %c0_i32_1 = arith.constant 0 : i32
    return %c0_i32, %c0_i32_0 : i32, i32
  }
  func.func @transform_3(%arg0: i32) -> (i32, i32) {
    %c0_i32 = arith.constant 0 : i32
    %c0_i32_0 = arith.constant 0 : i32
    return %arg0, %c0_i32 : i32, i32
  }
}

</mosaic_0001>

<bundles_post_ra>
// kernel: tpu_custom_call.1
= control target key start
LH: loop header
LB: loop body
LE: loop exit
PB: predicated region body
PF: predicated region fallthrough
CT: control target
= control target key end

     0   :  { %8 = vsyncpa [#allocation3], 0  ;;  %s264_s0 = inlined_call_operand.hbm [shape: f32[16,128], index: 0, kind: input, shape index: {}]   ;;  %s265_s1 = inlined_call_operand.hbm [shape: f32[1,128], index: 1, kind: input, shape index: {}]   ;;  %s266_s2 = inlined_call_operand.vmem [shape: f32[1,128], index: 2, kind: input, shape index: {}]   ;;  %s267_s3 = inlined_call_operand.hbm [shape: f32[16,128], index: 3, kind: output, shape index: {}]  }
   0x1   :  { %9 = vsyncpa [#allocation6], 0 }
   0x2   :  { %10 = vsyncpa [#allocation4], 0  ;;  %s15_s14 = sshll.u32 %s264_s0, 4  ;;  %s220_s15 = smov [#allocation2]   ;;  %s16_s14 = int_to_ptr.hbm [resolvable:$true] %s15_s14 }
   0x3   :  { %s17_s16 = sshll.u32 %s220_s15, 4  ;;  %s29_s19 = sshll.u32 %s265_s1, 4  ;;  %s18_s16 = int_to_ptr.vmem [resolvable:$true] %s17_s16  ;;  %s30_s19 = int_to_ptr.hbm [resolvable:$true] %s29_s19 }
   0x4   :  { %s221_s20 = smov 128   ;;  %s222_s21 = smov 8  }
   0x5   :  { %23 = dma.hbm_to_vmem [thread:$0]  %s16_s14, 256, %s18_s16, [#allocation3], %s221_s20, %s221_s20, %s222_s21  }
   0x6   :  { %s223_s22 = smov [#allocation5]  }
   0x7   :  { %s31_s23 = sshll.u32 %s223_s22, 4  ;;  %s32_s23 = int_to_ptr.vmem [resolvable:$true] %s31_s23 }
   0x8   :  { %34 = dma.hbm_to_vmem [thread:$0]  %s30_s19, 16, %s32_s23, [#allocation6]  }
   0x9   :  { %214 = dma.done.wait [#allocation3], 256  }
   0xa   :  { %215 = vsyncadd [#allocation3], 4294967040 }
   0xb   :  { %216 = dma.done.wait [#allocation6], 16  }
   0xc   :  { %217 = vsyncadd [#allocation6], 4294967280  ;;  %v45_v0 = vld [vmem:[#allocation2] sm:$0xff]  ;;  %v46_v1 = vld [vmem:[#allocation2 + $0x8] sm:$0xff]  ;;  %v224_v2 = vmov 128.0   ;;  %s225_s24 = smov [#allocation7]  }
   0xd   :  { %47 = vadd.xlane.f32.xlu0 %v45_v0  ;;  %136 = vrcp.f32 %v224_v2  ;;  %v134_v31 = vld [vmem:[#allocation5] ss:$0 sm:$0xff]  ;;  %v135_v35 = vld [vmem:[%s266_s2] ss:$0 sm:$0xff]  ;;  %s112_s25 = sshll.u32 %s225_s24, 4  ;;  %s114_s28 = sshll.u32 %s267_s3, 4  ;;  %s113_s25 = int_to_ptr.vmem [resolvable:$true] %s112_s25  ;;  %s115_s28 = int_to_ptr.hbm [resolvable:$true] %s114_s28 }
  0x13   :  { %v137_v3 = vpop.eup %136 }
  0x14   :  { %v52_v4 = vmul.f32 128.0, %v137_v3  ;;  %vm56_vm0 = vweird.f32 %v137_v3 }
  0x15   :  { %49 = vadd.xlane.f32.xlu0 %v46_v1 }
  0x16   :  { %v53_v5 = vsub.f32 1.0, %v52_v4 }
  0x18   :  { %v54_v6 = vmul.f32 %v137_v3, %v53_v5 }
  0x1a   :  { %v55_v7 = vadd.f32 %v137_v3, %v54_v6 }
  0x1c   :  { %v57_v8 = vsel %vm56_vm0, %v137_v3, %v55_v7 }
  0x80   :  { %v48_v9 = vpop.xlane.xlu0 %47 }
  0x81   :  { %v58_v10 = vmul.f32 %v57_v8, %v48_v9 }
  0x83   :  { %v60_v11 = vsub.f32 %v45_v0, %v58_v10 }
  0x85   :  { %v62_v12 = vmul.f32 %v60_v11, %v60_v11 }
  0x87   :  { %64 = vadd.xlane.f32.xlu1 %v62_v12 }
  0x88   :  { %v50_v13 = vpop.xlane.xlu0 %49 }
  0x89   :  { %v59_v14 = vmul.f32 %v57_v8, %v50_v13 }
  0x8b   :  { %v61_v15 = vsub.f32 %v46_v1, %v59_v14 }
  0x8d   :  { %v63_v16 = vmul.f32 %v61_v15, %v61_v15 }
  0x8f   :  { %66 = vadd.xlane.f32.xlu1 %v63_v16 }
  0xfa   :  { %v65_v17 = vpop.xlane.xlu1 %64 }
  0xfb   :  { %v68_v18 = vmul.f32 0.007874016, %v65_v17 }
  0xfd   :  { %v70_v19 = vadd.f32 1e-06, %v68_v18 }
  0xff   :  { %138 = vrsqrt.f32 %v70_v19  ;;  %vm78_vm2 = vweird.f32 %v70_v19 }
 0x102   :  { %v67_v20 = vpop.xlane.xlu1 %66 }
 0x103   :  { %v69_v21 = vmul.f32 0.007874016, %v67_v20 }
 0x105   :  { %v139_v22 = vpop.eup %138  ;;  %v71_v23 = vadd.f32 1e-06, %v69_v21 }
 0x106   :  { %v73_v24 = vmul.f32 %v139_v22, %v70_v19  ;;  %vm79_vm1 = vweird.f32 %v139_v22 }
 0x107   :  { %140 = vrsqrt.f32 %v71_v23  ;;  %vm80_vm3 = vmor %vm78_vm2, %vm79_vm1  ;;  %vm88_vm5 = vweird.f32 %v71_v23 }
 0x108   :  { %v74_v25 = vmul.f32 %v139_v22, %v73_v24 }
 0x10a   :  { %v75_v26 = vmul.f32 0.5, %v74_v25 }
 0x10c   :  { %v76_v27 = vsub.f32 1.5, %v75_v26 }
 0x10d   :  { %v141_v28 = vpop.eup %140 }
 0x10e   :  { %v77_v29 = vmul.f32 %v139_v22, %v76_v27  ;;  %v83_v30 = vmul.f32 %v141_v28, %v71_v23  ;;  %vm89_vm4 = vweird.f32 %v141_v28 }
 0x10f   :  { %vm90_vm6 = vmor %vm88_vm5, %vm89_vm4 }
 0x110   :  { %v81_v32 = vsel %vm80_vm3, %v139_v22, %v77_v29  ;;  %v84_v33 = vmul.f32 %v141_v28, %v83_v30 }
 0x111   :  { %v92_v34 = vmul.f32 %v81_v32, %v60_v11 }
 0x112   :  { %v85_v36 = vmul.f32 0.5, %v84_v33 }
 0x113   :  { %v98_v37 = vmul.f32 %v134_v31, %v92_v34 }
 0x114   :  { %v86_v38 = vsub.f32 1.5, %v85_v36 }
 0x115   :  { %v104_v39 = vadd.f32 %v135_v35, %v98_v37 }
 0x116   :  { %v87_v40 = vmul.f32 %v141_v28, %v86_v38 }
 0x117   :  { %106 = vst [vmem:[#allocation7] sm:$0xff] %v104_v39 }
 0x118   :  { %v91_v41 = vsel %vm90_vm6, %v141_v28, %v87_v40 }
 0x119   :  { %v93_v42 = vmul.f32 %v91_v41, %v61_v15 }
 0x11b   :  { %v99_v43 = vmul.f32 %v134_v31, %v93_v42 }
 0x11d   :  { %v105_v44 = vadd.f32 %v135_v35, %v99_v43 }
 0x11f   :  { %107 = vst [vmem:[#allocation7 + $0x8] sm:$0xff] %v105_v44 }
 0x120   :  { %120 = dma.vmem_to_hbm [thread:$0]  %s113_s25, 256, %s115_s28, [#allocation4], %s221_s20, %s221_s20, %s222_s21  }
 0x121   :  { %218 = dma.done.wait [#allocation4], 256  }
 0x122   :  { %219 = vsyncadd [#allocation4], 4294967040 }
 0x123   :  { %125 = vsyncpa [#allocation3], 1 }
 0x124   :  { %126 = vsyncpa [#allocation6], 1 }
 0x125   :  { %127 = vsyncpa [#allocation4], 1 }

</bundles_post_ra>
